<compile_context>
chip_gen: v7x
topology: tpu7x:2x2x1
jax: 0.10.0
libtpu: 0.0.40
codegen_flags: <defaults>
</compile_context>

<pallas_src>
import math

import jax
import jax.numpy as jnp
import numpy as np
from jax.experimental import pallas as pl
from jax.experimental.pallas import tpu as pltpu


def _full_spec(shape):
    # whole-array block (no grid): block_shape == array shape is always legal
    return pl.BlockSpec(shape, lambda: (0,) * len(shape))


def _vmem_limit_bytes(per_step_bytes):
    """VMEM budget with headroom below physical capacity (v7x has only 64 MiB)."""
    try:
        cap = int(pltpu.get_tpu_info().vmem_capacity_bytes)
        if cap <= 0:
            cap = 64 * 2 ** 20
    except Exception:                       # older jax / attr missing
        cap = 64 * 2 ** 20                  # conservative: v7x per-core VMEM
    want = max(16 * 2 ** 20, 4 * int(per_step_bytes))
    return int(min(want, int(0.75 * cap)))  # leave 25% for compiler scratch


# ---------------------------------------------------------------------------
# Fused per-graph GCN stack + attention kernel
#   grid = (graph,): adjacency block stays in VMEM across all 4 uses.
# ---------------------------------------------------------------------------
def _gcn_attn_kernel(adj_ref, x_ref, w1_ref, b1_ref, w2_ref, b2_ref,
                     w3_ref, b3_ref, wa1_ref, wa2_ref, wa3_ref, ba_ref,
                     feat_ref, attn_ref):
    a = adj_ref[0, :, :]                        # (P, P) bf16, read once per graph
    x = x_ref[0, :, :]                          # (P, F) f32

    def spmm(s):
        # adjacency matmul: bf16 operands on the native MXU path, f32 accumulate
        return jnp.dot(a, s.astype(jnp.bfloat16),
                       preferred_element_type=jnp.float32)

    # gcn1 / gcn2 / gcn3 (+ReLU); each projection computed exactly once.
    g1 = jnp.maximum(
        spmm(jnp.dot(x, w1_ref[...], preferred_element_type=jnp.float32))
        + b1_ref[...], 0.0)
    feat_ref[0, 0, :, :] = g1                   # layer-major: whole-row store

    g2 = jnp.maximum(
        spmm(jnp.dot(g1, w2_ref[...], preferred_element_type=jnp.float32))
        + b2_ref[...], 0.0)
    feat_ref[0, 1, :, :] = g2

    g3 = jnp.maximum(
        spmm(jnp.dot(g2, w3_ref[...], preferred_element_type=jnp.float32))
        + b3_ref[...], 0.0)
    feat_ref[0, 2, :, :] = g3

    # attention GCN on cat(g1, g2, g3): w_attn split row-wise (no in-kernel concat)
    sa = (jnp.dot(g1, wa1_ref[...], preferred_element_type=jnp.float32)
          + jnp.dot(g2, wa2_ref[...], preferred_element_type=jnp.float32)
          + jnp.dot(g3, wa3_ref[...], preferred_element_type=jnp.float32))
    attn_ref[0, :, :] = jnp.tanh(spmm(sa) + ba_ref[...])       # tanh on EUP


def fused_gcn_attention(adj_blocks, x_blocks, params):
    g, p, _ = adj_blocks.shape
    f = x_blocks.shape[-1]
    h = params["w1"].shape[1]

    adj_bf16 = adj_blocks.astype(jnp.bfloat16)  # halves the dominant HBM stream
    b1 = params["b1"].reshape(1, h)
    b2 = params["b2"].reshape(1, h)
    b3 = params["b3"].reshape(1, h)
    wa = params["w_attn"]
    wa1, wa2, wa3 = wa[:h], wa[h:2 * h], wa[2 * h:3 * h]
    ba = params["b_attn"].reshape(1, 1)

    per_step = (p * p * 2 + p * f * 4                         # adj (bf16) + x
                + (f * h + 2 * h * h + 3 * h + 3 * h + 1) * 4  # weights / biases
                + (3 * p * h + p) * 4                          # feat / attn blocks
                + 8 * p * h * 4)                               # temporaries
    # TODO(synk): tile the row dimension inside each graph (and pad P) when a
    # single (P, P) block no longer fits comfortably in VMEM.
    limit = _vmem_limit_bytes(per_step)

    feat, attn = pl.pallas_call(
        _gcn_attn_kernel,
        grid=(g,),
        in_specs=[
            pl.BlockSpec((1, p, p), lambda i: (i, 0, 0)),      # per-graph adjacency
            pl.BlockSpec((1, p, f), lambda i: (i, 0, 0)),      # per-graph features
            pl.BlockSpec((f, h), lambda i: (0, 0)),            # W1 (fetched once)
            pl.BlockSpec((1, h), lambda i: (0, 0)),            # b1
            pl.BlockSpec((h, h), lambda i: (0, 0)),            # W2
            pl.BlockSpec((1, h), lambda i: (0, 0)),            # b2
            pl.BlockSpec((h, h), lambda i: (0, 0)),            # W3
            pl.BlockSpec((1, h), lambda i: (0, 0)),            # b3
            pl.BlockSpec((h, 1), lambda i: (0, 0)),            # w_attn rows 0:H
            pl.BlockSpec((h, 1), lambda i: (0, 0)),            # w_attn rows H:2H
            pl.BlockSpec((h, 1), lambda i: (0, 0)),            # w_attn rows 2H:3H
            pl.BlockSpec((1, 1), lambda i: (0, 0)),            # b_attn
        ],
        out_specs=(
            pl.BlockSpec((1, 3, p, h), lambda i: (i, 0, 0, 0)),  # layer-major feat
            pl.BlockSpec((1, p, 1), lambda i: (i, 0, 0)),        # attention scores
        ),
        out_shape=(jax.ShapeDtypeStruct((g, 3, p, h), jnp.float32),
                   jax.ShapeDtypeStruct((g, p, 1), jnp.float32)),
        compiler_params=pltpu.CompilerParams(
            dimension_semantics=("parallel",),   # graphs independent -> v7x megacore
            vmem_limit_bytes=limit),
    )(adj_bf16, x_blocks, params["w1"], b1, params["w2"], b2, params["w3"], b3,
      wa1, wa2, wa3, ba)
    return feat, attn


# ---------------------------------------------------------------------------
# Fused readout (per-graph mean / max) + fc1/fc2/fc3 head
# ---------------------------------------------------------------------------
def _readout_mlp_kernel(feat_ref, score_ref, w1a_ref, w1b_ref, b1_ref,
                        w2_ref, b2_ref, w3_ref, b3_ref, out_ref):
    hidden = feat_ref[...] * score_ref[...]           # (G, keep, 3H)
    avg = jnp.mean(hidden, axis=1)                    # scatter_mean (exact divide)
    mx = jnp.max(hidden, axis=1)                      # scatter_max (keep >= 1 always)

    # fc1 on [avg | max] without an in-kernel concat: W1 split row-wise.
    h1 = jnp.maximum(
        jnp.dot(avg, w1a_ref[...], preferred_element_type=jnp.float32)
        + jnp.dot(mx, w1b_ref[...], preferred_element_type=jnp.float32)
        + b1_ref[...], 0.0)
    h2 = jnp.maximum(
        jnp.dot(h1, w2_ref[...], preferred_element_type=jnp.float32) + b2_ref[...],
        0.0)
    out_ref[...] = (jnp.dot(h2, w3_ref[...], preferred_element_type=jnp.float32)
                    + b3_ref[...])


def readout_mlp(sel_feat, sel_score, params):
    g, keep, f3 = sel_feat.shape
    h = params["fc1_w"].shape[1]
    h2 = params["fc2_w"].shape[1]
    c = params["fc3_w"].shape[1]
    w1a = params["fc1_w"][:f3]
    w1b = params["fc1_w"][f3:]
    b1 = params["fc1_b"].reshape(1, h)
    b2 = params["fc2_b"].reshape(1, h2)
    b3 = params["fc3_b"].reshape(1, c)
    # TODO(synk): tile over the kept-node axis (and fuse the kept-row gather via
    # PrefetchScalarGridSpec) if G*keep*3H ever outgrows a single VMEM block.
    return pl.pallas_call(
        _readout_mlp_kernel,
        out_shape=jax.ShapeDtypeStruct((g, c), jnp.float32),
        in_specs=[_full_spec((g, keep, f3)), _full_spec((g, keep, 1)),
                  _full_spec(w1a.shape), _full_spec(w1b.shape), _full_spec(b1.shape),
                  _full_spec(params["fc2_w"].shape), _full_spec(b2.shape),
                  _full_spec(params["fc3_w"].shape), _full_spec(b3.shape)],
        out_specs=_full_spec((g, c)),
    )(sel_feat, sel_score, w1a, w1b, b1, params["fc2_w"], b2, params["fc3_w"], b3)


# ---------------------------------------------------------------------------
# filter_adjacency renormalization  L = D^-1/2 (B + I) D^-1/2, per kept block
# ---------------------------------------------------------------------------
def _renorm_block_kernel(sub_ref, o_ref):
    sub = sub_ref[0, :, :]
    n = sub.shape[0]
    rows = jax.lax.broadcasted_iota(jnp.int32, (n, n), 0)
    cols = jax.lax.broadcasted_iota(jnp.int32, (n, n), 1)
    diag = rows == cols
    # off-diagonal nonzero pattern of the kept sub-block, values = 1
    b = jnp.where(jnp.logical_and(sub != 0.0, jnp.logical_not(diag)), 1.0, 0.0)
    a = b + diag.astype(jnp.float32)                           # B + I (degree >= 1)
    dinv = jax.lax.rsqrt(jnp.sum(a, axis=1, keepdims=True))    # (n, 1)
    scale = jax.lax.dot_general(dinv, dinv, (((1,), (1,)), ((), ())),
                                preferred_element_type=jnp.float32)  # dinv dinv^T
    o_ref[0, :, :] = a * scale


def renorm_adjacency_blocks(sub_blocks):
    g, k, _ = sub_blocks.shape
    return pl.pallas_call(
        _renorm_block_kernel,
        grid=(g,),
        in_specs=[pl.BlockSpec((1, k, k), lambda i: (i, 0, 0))],
        out_specs=pl.BlockSpec((1, k, k), lambda i: (i, 0, 0)),
        out_shape=jax.ShapeDtypeStruct((g, k, k), jnp.float32),
        compiler_params=pltpu.CompilerParams(dimension_semantics=("parallel",)),
    )(sub_blocks)


# ---------------------------------------------------------------------------
# ModelA forward
# ---------------------------------------------------------------------------
def model_a_forward(params, adj, x, graph_indicator, num_graphs, nodes_per_graph,
                    keep_ratio=0.5, compute_pool_adjacency=True):
    del graph_indicator
    # TODO(synk): ragged graph batches (uneven node counts) need padding + masks;
    # equal-size contiguous graphs assumed here.
    g_cnt, p = num_graphs, nodes_per_graph
    h = params["w1"].shape[1]

    # Batched adjacency is block-diagonal: extract the G diagonal (P, P) blocks
    # once and never stream the dense (N, N) matrix through the kernel.
    adj_blocks = jnp.stack([adj[i * p:(i + 1) * p, i * p:(i + 1) * p]
                            for i in range(g_cnt)])            # (G, P, P)
    x_blocks = x.reshape(g_cnt, p, -1)                         # (G, P, F)

    feat, attn = fused_gcn_attention(adj_blocks, x_blocks, params)
    scores = attn[:, :, 0]                                     # (G, P)

    # top_rank: keep the top int(keep_ratio * P) nodes per graph, original order.
    # TODO(synk): per-graph top-k + row gathers stay in plain JAX.
    keep = int(keep_ratio * p)
    if keep <= 0:
        raise ValueError("keep_ratio * nodes_per_graph must keep >= 1 node")
    order = jnp.argsort(-scores, axis=1)                       # descending
    kept_local = jnp.sort(order[:, :keep], axis=1)             # boolean-mask order

    # gather kept rows; reorder layer-major feat -> per-node [g1 | g2 | g3]
    sel = jax.vmap(lambda f, idx: f[:, idx, :])(feat, kept_local)   # (G, 3, keep, H)
    sel_feat = jnp.transpose(sel, (0, 2, 1, 3)).reshape(g_cnt, keep, 3 * h)
    sel_score = jax.vmap(lambda s, idx: s[idx])(scores, kept_local)[..., None]

    logits = readout_mlp(sel_feat, sel_score, params)          # (G, C)

    pool_adjacency = None
    if compute_pool_adjacency:
        # kept x kept sub-block is block-diagonal too: renormalize per graph.
        sub_blocks = jax.vmap(lambda a, idx: a[idx][:, idx])(adj_blocks, kept_local)
        norm_blocks = renorm_adjacency_blocks(sub_blocks)      # (G, keep, keep)
        pool_adjacency = jax.scipy.linalg.block_diag(
            *[norm_blocks[i] for i in range(g_cnt)])           # (G*keep, G*keep)
    return logits, pool_adjacency


# ---------------------------------------------------------------------------
# Deterministic parameter init (shapes from ModelA.__init__)
# ---------------------------------------------------------------------------
def init_params(key, input_dim, hidden_dim, num_classes):
    ks = jax.random.split(key, 7)

    def ku(k, shape):  # kaiming-uniform-like, deterministic
        bound = math.sqrt(6.0 / shape[0])
        return jax.random.uniform(k, shape, jnp.float32, -bound, bound)

    h = hidden_dim
    return {
        "w1": ku(ks[0], (input_dim, h)), "b1": jnp.zeros((h,), jnp.float32),
        "w2": ku(ks[1], (h, h)),         "b2": jnp.zeros((h,), jnp.float32),
        "w3": ku(ks[2], (h, h)),         "b3": jnp.zeros((h,), jnp.float32),
        "w_attn": ku(ks[3], (3 * h, 1)), "b_attn": jnp.zeros((1,), jnp.float32),
        "fc1_w": ku(ks[4], (3 * h * 2, h)),        "fc1_b": jnp.zeros((h,), jnp.float32),
        "fc2_w": ku(ks[5], (h, h // 2)),           "fc2_b": jnp.zeros((h // 2,), jnp.float32),
        "fc3_w": ku(ks[6], (h // 2, num_classes)), "fc3_b": jnp.zeros((num_classes,), jnp.float32),
    }


if __name__ == "__main__":
    key = jax.random.PRNGKey(0)
    k_param, k_adj, k_x = jax.random.split(key, 3)

    input_dim, hidden_dim, num_classes = 4, 32, 2
    num_graphs, nodes_per_graph = 2, 8
    N = num_graphs * nodes_per_graph

    params = init_params(k_param, input_dim, hidden_dim, num_classes)

    # symmetric random binary per-graph adjacencies (no self loops), normalized
    # per block D^-1/2 (A + I) D^-1/2 (== dataset normalization() on the
    # block-diagonal batch matrix).
    blocks = []
    for kg in jax.random.split(k_adj, num_graphs):
        r = jax.random.uniform(kg, (nodes_per_graph, nodes_per_graph))
        a = ((r + r.T) > 0.9).astype(jnp.float32)
        a = a * (1.0 - jnp.eye(nodes_per_graph, dtype=jnp.float32))
        a_hat = a + jnp.eye(nodes_per_graph, dtype=jnp.float32)
        d_inv = 1.0 / jnp.sqrt(jnp.sum(a_hat, axis=1))
        blocks.append(d_inv[:, None] * a_hat * d_inv[None, :])
    adj_norm = jax.scipy.linalg.block_diag(*blocks)            # dense (N, N)

    x = jax.random.normal(k_x, (N, input_dim), jnp.float32)
    graph_indicator = jnp.repeat(jnp.arange(num_graphs, dtype=jnp.int32),
                                 nodes_per_graph)

    logits, pool_adj = model_a_forward(params, adj_norm, x, graph_indicator,
                                       num_graphs, nodes_per_graph,
                                       keep_ratio=0.5, compute_pool_adjacency=True)
    jax.block_until_ready(logits)
    jax.block_until_ready(pool_adj)

    keep = int(0.5 * nodes_per_graph)
    assert logits.shape == (num_graphs, num_classes)
    assert pool_adj.shape == (num_graphs * keep, num_graphs * keep)
    assert bool(jnp.all(jnp.isfinite(logits)))

    # loose numeric check of the fused GCN/attention kernel vs plain JAX
    # (loose: bf16 adjacency stream + DEFAULT-precision projection matmuls).
    adj_blocks = jnp.stack(blocks)
    xb = x.reshape(num_graphs, nodes_per_graph, input_dim)
    a_bf = adj_blocks.astype(jnp.bfloat16)
    spmm = lambda s: jnp.einsum("gij,gjk->gik", a_bf, s.astype(jnp.bfloat16),
                                preferred_element_type=jnp.float32)
    g1 = jax.nn.relu(spmm(xb @ params["w1"]) + params["b1"])
    g2 = jax.nn.relu(spmm(g1 @ params["w2"]) + params["b2"])
    g3 = jax.nn.relu(spmm(g2 @ params["w3"]) + params["b3"])
    cat = jnp.concatenate([g1, g2, g3], axis=-1)
    attn_expect = jnp.tanh(spmm(cat @ params["w_attn"]) + params["b_attn"])
    feat_k, attn_k = fused_gcn_attention(adj_blocks, xb, params)
    np.testing.assert_allclose(np.asarray(feat_k[:, 0]), np.asarray(g1), rtol=0.1, atol=0.1)
    np.testing.assert_allclose(np.asarray(feat_k[:, 1]), np.asarray(g2), rtol=0.1, atol=0.1)
    np.testing.assert_allclose(np.asarray(feat_k[:, 2]), np.asarray(g3), rtol=0.1, atol=0.1)
    np.testing.assert_allclose(np.asarray(attn_k), np.asarray(attn_expect), rtol=0.1, atol=0.1)

    print("KERNEL_OK")
</pallas_src>

<mosaic_0001>
module attributes {stable_mosaic.version = 11 : i64} {
  func.func @_gcn_attn_kernel(%arg0: i32, %arg1: memref<1x8x8xbf16, #tpu.memory_space<vmem>>, %arg2: memref<1x8x4xf32, #tpu.memory_space<vmem>>, %arg3: memref<4x32xf32, #tpu.memory_space<vmem>>, %arg4: memref<1x32xf32, #tpu.memory_space<vmem>>, %arg5: memref<32x32xf32, #tpu.memory_space<vmem>>, %arg6: memref<1x32xf32, #tpu.memory_space<vmem>>, %arg7: memref<32x32xf32, #tpu.memory_space<vmem>>, %arg8: memref<1x32xf32, #tpu.memory_space<vmem>>, %arg9: memref<32x1xf32, #tpu.memory_space<vmem>>, %arg10: memref<32x1xf32, #tpu.memory_space<vmem>>, %arg11: memref<32x1xf32, #tpu.memory_space<vmem>>, %arg12: memref<1x1xf32, #tpu.memory_space<vmem>>, %arg13: memref<1x3x8x32xf32, #tpu.memory_space<vmem>>, %arg14: memref<1x8x1xf32, #tpu.memory_space<vmem>>) attributes {dimension_semantics = [#tpu.dimension_semantics<parallel>], iteration_bounds = array<i64: 2>, scalar_prefetch = 0 : i64, scratch_operands = 0 : i64, tpu.core_type = #tpu.core_type<tc>, window_params = [{transform_indices = @transform_0, window_bounds = array<i64: 1, 8, 8>}, {transform_indices = @transform_1, window_bounds = array<i64: 1, 8, 4>}, {pipeline_mode = #tpu.pipeline_mode<synchronous>, transform_indices = @transform_2, window_bounds = array<i64: 4, 32>}, {pipeline_mode = #tpu.pipeline_mode<synchronous>, transform_indices = @transform_3, window_bounds = array<i64: 1, 32>}, {pipeline_mode = #tpu.pipeline_mode<synchronous>, transform_indices = @transform_4, window_bounds = array<i64: 32, 32>}, {pipeline_mode = #tpu.pipeline_mode<synchronous>, transform_indices = @transform_5, window_bounds = array<i64: 1, 32>}, {pipeline_mode = #tpu.pipeline_mode<synchronous>, transform_indices = @transform_6, window_bounds = array<i64: 32, 32>}, {pipeline_mode = #tpu.pipeline_mode<synchronous>, transform_indices = @transform_7, window_bounds = array<i64: 1, 32>}, {pipeline_mode = #tpu.pipeline_mode<synchronous>, transform_indices = @transform_8, window_bounds = array<i64: 32, 1>}, {pipeline_mode = #tpu.pipeline_mode<synchronous>, transform_indices = @transform_9, window_bounds = array<i64: 32, 1>}, {pipeline_mode = #tpu.pipeline_mode<synchronous>, transform_indices = @transform_10, window_bounds = array<i64: 32, 1>}, {pipeline_mode = #tpu.pipeline_mode<synchronous>, transform_indices = @transform_11, window_bounds = array<i64: 1, 1>}, {transform_indices = @transform_12, window_bounds = array<i64: 1, 3, 8, 32>}, {transform_indices = @transform_13, window_bounds = array<i64: 1, 8, 1>}]} {
    %c0 = arith.constant 0 : index
    %c0_0 = arith.constant 0 : index
    %c0_1 = arith.constant 0 : index
    %0 = vector.load %arg1[%c0, %c0_0, %c0_1] : memref<1x8x8xbf16, #tpu.memory_space<vmem>>, vector<1x8x8xbf16>
    %1 = vector.shape_cast %0 : vector<1x8x8xbf16> to vector<8x8xbf16>
    %c0_2 = arith.constant 0 : index
    %c0_3 = arith.constant 0 : index
    %c0_4 = arith.constant 0 : index
    %2 = vector.load %arg2[%c0_2, %c0_3, %c0_4] : memref<1x8x4xf32, #tpu.memory_space<vmem>>, vector<1x8x4xf32>
    %3 = vector.shape_cast %2 : vector<1x8x4xf32> to vector<8x4xf32>
    %c0_5 = arith.constant 0 : index
    %c0_6 = arith.constant 0 : index
    %4 = vector.load %arg3[%c0_5, %c0_6] : memref<4x32xf32, #tpu.memory_space<vmem>>, vector<4x32xf32>
    %cst = arith.constant dense<0.000000e+00> : vector<8x32xf32>
    %5 = tpu.matmul %3, %4, %cst {dimension_numbers = #tpu.dot_dimension_numbers<[1], [0], [0], [1], [0, 0, 1, 1], [], []>} : vector<8x4xf32>, vector<4x32xf32>, vector<8x32xf32> -> vector<8x32xf32>
    %6 = arith.truncf %5 : vector<8x32xf32> to vector<8x32xbf16>
    %cst_7 = arith.constant dense<0.000000e+00> : vector<8x32xf32>
    %7 = tpu.matmul %1, %6, %cst_7 {dimension_numbers = #tpu.dot_dimension_numbers<[1], [0], [0], [1], [0, 0, 1, 1], [], []>} : vector<8x8xbf16>, vector<8x32xbf16>, vector<8x32xf32> -> vector<8x32xf32>
    %c0_8 = arith.constant 0 : index
    %c0_9 = arith.constant 0 : index
    %8 = vector.load %arg4[%c0_8, %c0_9] : memref<1x32xf32, #tpu.memory_space<vmem>>, vector<1x32xf32>
    %9 = vector.broadcast %8 : vector<1x32xf32> to vector<8x32xf32>
    %10 = arith.addf %7, %9 : vector<8x32xf32>
    %cst_10 = arith.constant 0.000000e+00 : f32
    %11 = vector.broadcast %cst_10 : f32 to vector<8x32xf32>
    %12 = arith.maximumf %10, %11 : vector<8x32xf32>
    %c0_11 = arith.constant 0 : index
    %c0_12 = arith.constant 0 : index
    %c0_13 = arith.constant 0 : index
    %c0_14 = arith.constant 0 : index
    %13 = vector.load %arg13[%c0_11, %c0_12, %c0_13, %c0_14] : memref<1x3x8x32xf32, #tpu.memory_space<vmem>>, vector<1x1x8x32xf32>
    %14 = vector.shape_cast %13 : vector<1x1x8x32xf32> to vector<8x32xf32>
    %15 = vector.shape_cast %12 : vector<8x32xf32> to vector<1x1x8x32xf32>
    tpu.vector_store %arg13[%c0_11, %c0_12, %c0_13, %c0_14], %15 {strides = array<i32>} : memref<1x3x8x32xf32, #tpu.memory_space<vmem>>, vector<1x1x8x32xf32>,
    %c0_15 = arith.constant 0 : index
    %c0_16 = arith.constant 0 : index
    %16 = vector.load %arg5[%c0_15, %c0_16] : memref<32x32xf32, #tpu.memory_space<vmem>>, vector<32x32xf32>
    %cst_17 = arith.constant dense<0.000000e+00> : vector<8x32xf32>
    %17 = tpu.matmul %12, %16, %cst_17 {dimension_numbers = #tpu.dot_dimension_numbers<[1], [0], [0], [1], [0, 0, 1, 1], [], []>} : vector<8x32xf32>, vector<32x32xf32>, vector<8x32xf32> -> vector<8x32xf32>
    %18 = arith.truncf %17 : vector<8x32xf32> to vector<8x32xbf16>
    %cst_18 = arith.constant dense<0.000000e+00> : vector<8x32xf32>
    %19 = tpu.matmul %1, %18, %cst_18 {dimension_numbers = #tpu.dot_dimension_numbers<[1], [0], [0], [1], [0, 0, 1, 1], [], []>} : vector<8x8xbf16>, vector<8x32xbf16>, vector<8x32xf32> -> vector<8x32xf32>
    %c0_19 = arith.constant 0 : index
    %c0_20 = arith.constant 0 : index
    %20 = vector.load %arg6[%c0_19, %c0_20] : memref<1x32xf32, #tpu.memory_space<vmem>>, vector<1x32xf32>
    %21 = vector.broadcast %20 : vector<1x32xf32> to vector<8x32xf32>
    %22 = arith.addf %19, %21 : vector<8x32xf32>
    %cst_21 = arith.constant 0.000000e+00 : f32
    %23 = vector.broadcast %cst_21 : f32 to vector<8x32xf32>
    %24 = arith.maximumf %22, %23 : vector<8x32xf32>
    %c0_22 = arith.constant 0 : index
    %c1 = arith.constant 1 : index
    %c0_23 = arith.constant 0 : index
    %c0_24 = arith.constant 0 : index
    %25 = vector.load %arg13[%c0_22, %c1, %c0_23, %c0_24] : memref<1x3x8x32xf32, #tpu.memory_space<vmem>>, vector<1x1x8x32xf32>
    %26 = vector.shape_cast %25 : vector<1x1x8x32xf32> to vector<8x32xf32>
    %27 = vector.shape_cast %24 : vector<8x32xf32> to vector<1x1x8x32xf32>
    tpu.vector_store %arg13[%c0_22, %c1, %c0_23, %c0_24], %27 {strides = array<i32>} : memref<1x3x8x32xf32, #tpu.memory_space<vmem>>, vector<1x1x8x32xf32>,
    %c0_25 = arith.constant 0 : index
    %c0_26 = arith.constant 0 : index
    %28 = vector.load %arg7[%c0_25, %c0_26] : memref<32x32xf32, #tpu.memory_space<vmem>>, vector<32x32xf32>
    %cst_27 = arith.constant dense<0.000000e+00> : vector<8x32xf32>
    %29 = tpu.matmul %24, %28, %cst_27 {dimension_numbers = #tpu.dot_dimension_numbers<[1], [0], [0], [1], [0, 0, 1, 1], [], []>} : vector<8x32xf32>, vector<32x32xf32>, vector<8x32xf32> -> vector<8x32xf32>
    %30 = arith.truncf %29 : vector<8x32xf32> to vector<8x32xbf16>
    %cst_28 = arith.constant dense<0.000000e+00> : vector<8x32xf32>
    %31 = tpu.matmul %1, %30, %cst_28 {dimension_numbers = #tpu.dot_dimension_numbers<[1], [0], [0], [1], [0, 0, 1, 1], [], []>} : vector<8x8xbf16>, vector<8x32xbf16>, vector<8x32xf32> -> vector<8x32xf32>
    %c0_29 = arith.constant 0 : index
    %c0_30 = arith.constant 0 : index
    %32 = vector.load %arg8[%c0_29, %c0_30] : memref<1x32xf32, #tpu.memory_space<vmem>>, vector<1x32xf32>
    %33 = vector.broadcast %32 : vector<1x32xf32> to vector<8x32xf32>
    %34 = arith.addf %31, %33 : vector<8x32xf32>
    %cst_31 = arith.constant 0.000000e+00 : f32
    %35 = vector.broadcast %cst_31 : f32 to vector<8x32xf32>
    %36 = arith.maximumf %34, %35 : vector<8x32xf32>
    %c0_32 = arith.constant 0 : index
    %c2 = arith.constant 2 : index
    %c0_33 = arith.constant 0 : index
    %c0_34 = arith.constant 0 : index
    %37 = vector.load %arg13[%c0_32, %c2, %c0_33, %c0_34] : memref<1x3x8x32xf32, #tpu.memory_space<vmem>>, vector<1x1x8x32xf32>
    %38 = vector.shape_cast %37 : vector<1x1x8x32xf32> to vector<8x32xf32>
    %39 = vector.shape_cast %36 : vector<8x32xf32> to vector<1x1x8x32xf32>
    tpu.vector_store %arg13[%c0_32, %c2, %c0_33, %c0_34], %39 {strides = array<i32>} : memref<1x3x8x32xf32, #tpu.memory_space<vmem>>, vector<1x1x8x32xf32>,
    %c0_35 = arith.constant 0 : index
    %c0_36 = arith.constant 0 : index
    %40 = vector.load %arg9[%c0_35, %c0_36] : memref<32x1xf32, #tpu.memory_space<vmem>>, vector<32x1xf32>
    %cst_37 = arith.constant dense<0.000000e+00> : vector<8x1xf32>
    %41 = tpu.matmul %12, %40, %cst_37 {dimension_numbers = #tpu.dot_dimension_numbers<[1], [0], [0], [1], [0, 0, 1, 1], [], []>} : vector<8x32xf32>, vector<32x1xf32>, vector<8x1xf32> -> vector<8x1xf32>
    %c0_38 = arith.constant 0 : index
    %c0_39 = arith.constant 0 : index
    %42 = vector.load %arg10[%c0_38, %c0_39] : memref<32x1xf32, #tpu.memory_space<vmem>>, vector<32x1xf32>
    %cst_40 = arith.constant dense<0.000000e+00> : vector<8x1xf32>
    %43 = tpu.matmul %24, %42, %cst_40 {dimension_numbers = #tpu.dot_dimension_numbers<[1], [0], [0], [1], [0, 0, 1, 1], [], []>} : vector<8x32xf32>, vector<32x1xf32>, vector<8x1xf32> -> vector<8x1xf32>
    %44 = arith.addf %41, %43 : vector<8x1xf32>
    %c0_41 = arith.constant 0 : index
    %c0_42 = arith.constant 0 : index
    %45 = vector.load %arg11[%c0_41, %c0_42] : memref<32x1xf32, #tpu.memory_space<vmem>>, vector<32x1xf32>
    %cst_43 = arith.constant dense<0.000000e+00> : vector<8x1xf32>
    %46 = tpu.matmul %36, %45, %cst_43 {dimension_numbers = #tpu.dot_dimension_numbers<[1], [0], [0], [1], [0, 0, 1, 1], [], []>} : vector<8x32xf32>, vector<32x1xf32>, vector<8x1xf32> -> vector<8x1xf32>
    %47 = arith.addf %44, %46 : vector<8x1xf32>
    %48 = arith.truncf %47 : vector<8x1xf32> to vector<8x1xbf16>
    %cst_44 = arith.constant dense<0.000000e+00> : vector<8x1xf32>
    %49 = tpu.matmul %1, %48, %cst_44 {dimension_numbers = #tpu.dot_dimension_numbers<[1], [0], [0], [1], [0, 0, 1, 1], [], []>} : vector<8x8xbf16>, vector<8x1xbf16>, vector<8x1xf32> -> vector<8x1xf32>
    %c0_45 = arith.constant 0 : index
    %c0_46 = arith.constant 0 : index
    %50 = vector.load %arg12[%c0_45, %c0_46] : memref<1x1xf32, #tpu.memory_space<vmem>>, vector<1x1xf32>
    %51 = vector.broadcast %50 : vector<1x1xf32> to vector<8x1xf32>
    %52 = arith.addf %49, %51 : vector<8x1xf32>
    %53 = math.tanh %52 : vector<8x1xf32>
    %c0_47 = arith.constant 0 : index
    %c0_48 = arith.constant 0 : index
    %c0_49 = arith.constant 0 : index
    %54 = vector.load %arg14[%c0_47, %c0_48, %c0_49] : memref<1x8x1xf32, #tpu.memory_space<vmem>>, vector<1x8x1xf32>
    %55 = vector.shape_cast %54 : vector<1x8x1xf32> to vector<8x1xf32>
    %56 = vector.shape_cast %53 : vector<8x1xf32> to vector<1x8x1xf32>
    tpu.vector_store %arg14[%c0_47, %c0_48, %c0_49], %56 {strides = array<i32>} : memref<1x8x1xf32, #tpu.memory_space<vmem>>, vector<1x8x1xf32>,
    return
  }
  func.func @transform_0(%arg0: i32) -> (i32, i32, i32) {
    %c0_i32 = arith.constant 0 : i32
    %c0_i32_0 = arith.constant 0 : i32
    %c0_i32_1 = arith.constant 0 : i32
    return %arg0, %c0_i32, %c0_i32_0 : i32, i32, i32
  }
  func.func @transform_1(%arg0: i32) -> (i32, i32, i32) {
    %c0_i32 = arith.constant 0 : i32
    %c0_i32_0 = arith.constant 0 : i32
    %c0_i32_1 = arith.constant 0 : i32
    return %arg0, %c0_i32, %c0_i32_0 : i32, i32, i32
  }
  func.func @transform_2(%arg0: i32) -> (i32, i32) {
    %c0_i32 = arith.constant 0 : i32
    %c0_i32_0 = arith.constant 0 : i32
    %c0_i32_1 = arith.constant 0 : i32
    return %c0_i32, %c0_i32_0 : i32, i32
  }
  func.func @transform_3(%arg0: i32) -> (i32, i32) {
    %c0_i32 = arith.constant 0 : i32
    %c0_i32_0 = arith.constant 0 : i32
    %c0_i32_1 = arith.constant 0 : i32
    return %c0_i32, %c0_i32_0 : i32, i32
  }
  func.func @transform_4(%arg0: i32) -> (i32, i32) {
    %c0_i32 = arith.constant 0 : i32
    %c0_i32_0 = arith.constant 0 : i32
    %c0_i32_1 = arith.constant 0 : i32
    return %c0_i32, %c0_i32_0 : i32, i32
  }
  func.func @transform_5(%arg0: i32) -> (i32, i32) {
    %c0_i32 = arith.constant 0 : i32
    %c0_i32_0 = arith.constant 0 : i32
    %c0_i32_1 = arith.constant 0 : i32
    return %c0_i32, %c0_i32_0 : i32, i32
  }
  func.func @transform_6(%arg0: i32) -> (i32, i32) {
    %c0_i32 = arith.constant 0 : i32
    %c0_i32_0 = arith.constant 0 : i32
    %c0_i32_1 = arith.constant 0 : i32
    return %c0_i32, %c0_i32_0 : i32, i32
  }
  func.func @transform_7(%arg0: i32) -> (i32, i32) {
    %c0_i32 = arith.constant 0 : i32
    %c0_i32_0 = arith.constant 0 : i32
    %c0_i32_1 = arith.constant 0 : i32
    return %c0_i32, %c0_i32_0 : i32, i32
  }
  func.func @transform_8(%arg0: i32) -> (i32, i32) {
    %c0_i32 = arith.constant 0 : i32
    %c0_i32_0 = arith.constant 0 : i32
    %c0_i32_1 = arith.constant 0 : i32
    return %c0_i32, %c0_i32_0 : i32, i32
  }
  func.func @transform_9(%arg0: i32) -> (i32, i32) {
    %c0_i32 = arith.constant 0 : i32
    %c0_i32_0 = arith.constant 0 : i32
    %c0_i32_1 = arith.constant 0 : i32
    return %c0_i32, %c0_i32_0 : i32, i32
  }
  func.func @transform_10(%arg0: i32) -> (i32, i32) {
    %c0_i32 = arith.constant 0 : i32
    %c0_i32_0 = arith.constant 0 : i32
    %c0_i32_1 = arith.constant 0 : i32
    return %c0_i32, %c0_i32_0 : i32, i32
  }
  func.func @transform_11(%arg0: i32) -> (i32, i32) {
    %c0_i32 = arith.constant 0 : i32
    %c0_i32_0 = arith.constant 0 : i32
    %c0_i32_1 = arith.constant 0 : i32
    return %c0_i32, %c0_i32_0 : i32, i32
  }
  func.func @transform_12(%arg0: i32) -> (i32, i32, i32, i32) {
    %c0_i32 = arith.constant 0 : i32
    %c0_i32_0 = arith.constant 0 : i32
    %c0_i32_1 = arith.constant 0 : i32
    %c0_i32_2 = arith.constant 0 : i32
    return %arg0, %c0_i32, %c0_i32_0, %c0_i32_1 : i32, i32, i32, i32
  }
  func.func @transform_13(%arg0: i32) -> (i32, i32, i32) {
    %c0_i32 = arith.constant 0 : i32
    %c0_i32_0 = arith.constant 0 : i32
    %c0_i32_1 = arith.constant 0 : i32
    return %arg0, %c0_i32, %c0_i32_0 : i32, i32, i32
  }
}

</mosaic_0001>

<bundles_post_ra>
// kernel: tpu_custom_call.1
= control target key start
LH: loop header
LB: loop body
LE: loop exit
PB: predicated region body
PF: predicated region fallthrough
CT: control target
= control target key end

     0   :  { %s1895_s0 = inlined_call_operand.vmem [shape: bf16[2,8,8], index: 0, kind: input, shape index: {}]   ;;  %s1896_s1 = inlined_call_operand.vmem [shape: f32[2,8,4], index: 1, kind: input, shape index: {}]   ;;  %s1897_s2 = inlined_call_operand.vmem [shape: f32[4,32], index: 2, kind: input, shape index: {}]   ;;  %s1898_s3 = inlined_call_operand.vmem [shape: f32[1,32], index: 3, kind: input, shape index: {}]   ;;  %s1899_s4 = inlined_call_operand.vmem [shape: f32[32,32], index: 4, kind: input, shape index: {}]   ;;  %s1900_s5 = inlined_call_operand.vmem [shape: f32[1,32], index: 5, kind: input, shape index: {}]   ;;  %s1901_s6 = inlined_call_operand.vmem [shape: f32[32,32], index: 6, kind: input, shape index: {}]   ;;  %s1902_s7 = inlined_call_operand.vmem [shape: f32[1,32], index: 7, kind: input, shape index: {}]   ;;  %s1903_s8 = inlined_call_operand.vmem [shape: f32[32,1], index: 8, kind: input, shape index: {}]   ;;  %s1904_s9 = inlined_call_operand.vmem [shape: f32[32,1], index: 9, kind: input, shape index: {}]   ;;  %s1905_s10 = inlined_call_operand.vmem [shape: f32[32,1], index: 10, kind: input, shape index: {}]   ;;  %s1906_s11 = inlined_call_operand.<no memory space> [shape: f32[1,1], index: 11, kind: input, shape index: {}]   ;;  %s1907_s12 = inlined_call_operand.hbm [shape: f32[2,3,8,32], index: 12, kind: output, shape index: {0}]   ;;  %s1908_s13 = inlined_call_operand.vmem [shape: f32[2,8,1], index: 13, kind: output, shape index: {1}]  }
   0x1   :  { %1911 = sst [smem:[#allocation7_spill]] %s1897_s2  ;;  %v19_v0 = vstv %s1906_s11 }
   0x2   :  { %20 = vst [vmem:[#allocation2] sm:$0x1] %v19_v0 }
   0x3   :  { %21 = vsyncpa [#allocation4], 0 }
   0x4   :  { %23 = vsyncpa [#allocation4 + $0x1], 0  ;;  %s1638_s27 = smov 0   ;;  %s1640_s28 = smov 0  }
   0x5   :  { %s1642_s29 = smov 0   ;;  %s1644_s30 = smov 0  }
   0x6 LB: > { %s1659_s11 = sadd.s32 4294967295, %s1557_s30   ;;  %s1267_s14 = sadd.s32 4294967294, %s1557_s30   ;;  %s1557_s30 = sphi %s1644_s30, %s1922_s30   ;;  %s1553_s29 = sphi %s1642_s29, %s1921_s29   ;;  %s1549_s28 = sphi %s1640_s28, %s1920_s28   ;;  %s1545_s27 = sphi %s1638_s27, %s1919_s27  }
   0x7   : > { %s1663_s15 = sadd.s32 1, %s1557_s30   ;;  %s298_s16 = sadd.s32 1, %s1553_s29 }
   0x8   : > { %s295_s17 = ssub.s32 %s1557_s30, %s1663_s15  ;;  %p308_p0 = scmp.ne.s32.totalorder %s1553_s29, %s1549_s28 }
   0x9   : > { %p296_p1 = scmp.eq.s32.totalorder %s295_s17, 0  ;;  %p309_p2 = scmp.eq.s32.totalorder %s1659_s11, 1 }
   0xa   : > { %p314_p3 = scmp.ne.s32.totalorder %s1549_s28, %s1545_s27  ;;  %p315_p4 = scmp.eq.s32.totalorder %s1267_s14, 1 }
   0xb   : > { %s1674_s18 = scalar_select %p296_p1, %s1553_s29, %s298_s16  }
   0xc   : > { %p1676_p5 = por %p309_p2, %p308_p0  ;;  %p1680_p6 = por %p315_p4, %p314_p3 }
   0xd   : > { %1912 = sst [smem:[#allocation6_spill]] %s1674_s18  ;;  %p1270_p7 = scmp.ge.s32.totalorder %s1557_s30, 1 }
   0xe   : > { %p403_p8 = scmp.lt.s32.totalorder %s1557_s30, 3 }
  0x10   : > { %p404_p9 = pnand %p1270_p7, %p403_p8 }
  0x11   : > { %s1915_s2 = sld [smem:[#allocation7_spill]] (!%p404_p9)  ;;  %vm474_vm0 = vcmask (!%p404_p9), 1043456   ;;  %p454_p10 = scmp.lt.s32.totalorder (!%p404_p9), %s1659_s11, 1  ;;  %v1559_v2 = vmov (!%p404_p9), 0.0   ;;  %vm1560_vm1 = vmmov (!%p404_p9), 0   ;;  %vm470_vm2 = vcmask (!%p404_p9), 31744  }
  0x12   : > { %407 = sbr.rel (%p404_p9) target bundleno = 1776 (0x6f0), region = 68  ;;  %1329 = vmatprep.subr.mxu0 (!%p404_p9), %v1559_v2  ;;  %1331 = vmatprep.mubr.msk.f32.mxu0 (!%p404_p9), %vm1560_vm1, %v1559_v2  ;;  %v1561_v4 = vmov (!%p404_p9), 0.0|0.0   ;;  %v606_v8 = vld [vmem:[%s1899_s4] sm:$0xff] (!%p404_p9)  ;;  %v607_v9 = vld [vmem:[%s1899_s4 + $0x8] sm:$0xff] (!%p404_p9)  ;;  %vm556_vm3 = vcmask (!%p404_p9), 64512   ;;  %v608_v13 = vld [vmem:[%s1899_s4 + $0x10] sm:$0xff] (!%p404_p9) }
  0x13   : > { %1334 = vmatprep.subr.bf16.mxu1 (!%p404_p9), %v1559_v2  ;;  %1336 = vmatprep.mubr.msk.bf16.mxu1 (!%p404_p9), %vm1560_vm1, %v1559_v2  ;;  %v1414_v12 = vpack.c.bf16 (!%p404_p9), %v607_v9, %v606_v8  ;;  %v609_v14 = vld [vmem:[%s1899_s4 + $0x18] sm:$0xff] (!%p404_p9)  ;;  %s1910_s17 = sand.u32 (!%p404_p9), 1, %s1549_s28   ;;  %v1276_v16 = vld [vmem:[%s1898_s3] ss:$0 sm:$0xff] (!%p404_p9)  ;;  %vm604_vm4 = vcmask (!%p404_p9), 261120   ;;  %v738_v24 = vld [vmem:[%s1901_s6 + $0x8] sm:$0xff] (!%p404_p9) }
  0x14   : > { %v1417_v15 = vpack.c.bf16 (!%p404_p9), %v609_v14, %v608_v13  ;;  %s1447_s21 = smul.u32 (!%p404_p9), 24, %s1910_s17  ;;  %v737_v23 = vld [vmem:[%s1901_s6] sm:$0xff] (!%p404_p9)  ;;  %v739_v30 = vld [vmem:[%s1901_s6 + $0x10] sm:$0xff] (!%p404_p9)  ;;  %v740_v31 = vld [vmem:[%s1901_s6 + $0x18] sm:$0xff] (!%p404_p9) }
  0x15   : > { %v1420_v25 = vpack.c.bf16 (!%p404_p9), %v738_v24, %v737_v23  ;;  %v1423_v32 = vpack.c.bf16 (!%p404_p9), %v740_v31, %v739_v30  ;;  %v1279_v33 = vld [vmem:[%s1900_s5] ss:$0 sm:$0xff] (!%p404_p9)  ;;  %v873_v35 = vld [vmem:[%s1904_s9 + $0x8] sm:$0xff] (!%p404_p9)  ;;  %v874_v43 = vld [vmem:[%s1904_s9 + $0x10] sm:$0xff] (!%p404_p9)  ;;  %s1448_s17 = smul.u32 (!%p404_p9), 384, %s1659_s11 }
  0x16   : > { %s1741_s26 = scalar_lea.vmem (!%p404_p9), [#allocation3], %s1447_s21  ;;  %v872_v34 = vld [vmem:[%s1904_s9] sm:$0xff] (!%p404_p9)  ;;  %v875_v44 = vld [vmem:[%s1904_s9 + $0x18] sm:$0xff] (!%p404_p9)  ;;  %v869_v47 = vld [vmem:[%s1903_s8 + $0x8] sm:$0xff] (!%p404_p9) }
  0x17   : > { %v469_v1 = vld [vmem:[%s1915_s2] sm:$0xf] (!%p404_p9)  ;;  %v1426_v40 = vpack.c.bf16 (!%p404_p9), %v873_v35, %v872_v34  ;;  %v1429_v45 = vpack.c.bf16 (!%p404_p9), %v875_v44, %v874_v43  ;;  %v870_v49 = vld [vmem:[%s1903_s8 + $0x10] sm:$0xff] (!%p404_p9)  ;;  %v871_v50 = vld [vmem:[%s1903_s8 + $0x18] sm:$0xff] (!%p404_p9)  ;;  %s1845_s21 = scalar_lea.hbm (!%p404_p9), %s1907_s12, %s1448_s17 }
  0x18   : > { %1330 = vmatpush3.msk.msra.mxu0 (!%p404_p9), %vm474_vm0, %v469_v1  ;;  %v868_v46 = vld [vmem:[%s1903_s8] sm:$0xff] (!%p404_p9)  ;;  %v1435_v51 = vpack.c.bf16 (!%p404_p9), %v871_v50, %v870_v49  ;;  %v1017_v53 = vld [vmem:[%s1905_s10 + $0x8] sm:$0xff] (!%p404_p9)  ;;  %v1018_v59 = vld [vmem:[%s1905_s10 + $0x10] sm:$0xff] (!%p404_p9) }
  0x19   : > { %s1695_s23 = scalar_select %p454_p10, %s1659_s11, 1  ;;  %1419 = vmatprep.subr.bf16.mxu0 %v1561_v4  ;;  %v1432_v48 = vpack.c.bf16 %v869_v47, %v868_v46  ;;  %v1016_v52 = vld [vmem:[%s1905_s10] sm:$0xff]  ;;  %v1019_v60 = vld [vmem:[%s1905_s10 + $0x18] sm:$0xff] }
  0x1a   : > { %v1438_v54 = vpack.c.bf16 %v1017_v53, %v1016_v52  ;;  %v1441_v61 = vpack.c.bf16 %v1019_v60, %v1018_v59  ;;  %v1283_v62 = vld [vmem:[%s1902_s7] ss:$0 sm:$0xff] }
  0x1b   : > { %s1909_s24 = sshll.u32 %s1695_s23, 3  ;;  %s1271_s16 = sshll.u32 %s1695_s23, 2 }
  0x1c   : > { %s461_s14 = scalar_lea.vmem %s1896_s1, %s1909_s24  ;;  %s457_s22 = scalar_lea.vmem %s1895_s0, %s1271_s16 }
  0x1d   : > { %v468_v3 = vld [vmem:[%s461_s14] sm:$0xff]  ;;  %s1166_s24 = sshll.u32 %s1741_s26, 4  ;;  %s1840_s24 = int_to_ptr.vmem [resolvable:$true] %s1166_s24 }
  0x1e   : > { %1332 = vmatmul.mubr.msk.f32.vlgmr.msra.gmra.mrb[0].mxu0 %vm470_vm2, %v468_v3  ;;  %v1720_v11 = vld [vmem:[%s457_s22] sm:$0xf]  ;;  %s1916_s22 = sand.u32 1, %s1549_s28   ;;  %s1495_s2 = scalar_lea.vmem %s1840_s24, 384 }
  0x1f   : > { %1365 = vmatprep.mubr.msk.f32.mxu0 %vm1560_vm1, %v1559_v2  ;;  %1421 = vmatpush3.bf16.msra.mxu0 %v1420_v25  ;;  %s1849_s25 = scalar_lea.sflag [#allocation4], %s1916_s22  ;;  %p1496_p11 = scmp.ne.s32.totalorder %s1840_s24, %s1495_s2 }
  0x20   : > { %1422 = vmatprep.subr.bf16.mxu0 %v1561_v4 }
  0x21   : > { %p1497_p12 = pnand %p1496_p11, %p1676_p5 }
  0x23   : > { %1424 = vmatpush3.bf16.msra.mxu0 %v1423_v32  ;;  %p1498_p13 = pneg %p1497_p12 }
  0x24   : > { %1425 = vmatprep.subr.bf16.mxu0 %v1561_v4 }
  0xf1   : > { %v544_v5 = vpop.f32.mrb[0].mxu0 }
  0xf2   : > { %v548_v6 = vpack.c.bf16 %v544_v5, %v544_v5  ;;  %v1333_v7 = vpop.f32.mrb[1].mxu0 }
  0xf4   : > { %v561_v10 = vsel %vm474_vm0, %v548_v6, 0 }
  0xf5   : > { %1335 = vmatpush3.bf16.msra.mxu1 %v561_v10 }
  0xf6   : > { %1413 = vmatprep.subr.bf16.mxu1 %v1561_v4 }
  0xf8   : > { %1337 = vmatmul.mubr.msk.bf16.vlgmr.msra.gmra.mrb[0].mxu1 %vm556_vm3, %v1720_v11 }
  0xf9   : > { %1415 = vmatpush3.bf16.msra.mxu1 %v1414_v12  ;;  %1348 = vmatprep.mubr.msk.f32.mxu1 %vm1560_vm1, %v1559_v2 }
  0xfa   : > { %1416 = vmatprep.subr.bf16.mxu1 %v1561_v4 }
  0xfd   : > { %1418 = vmatpush3.bf16.msra.mxu1 %v1417_v15 }
  0xfe   : > { %1351 = vmatprep.subr.bf16.mxu1 %v1559_v2 }
 0x1cb   : > { %v597_v17 = vpop.f32.mrb[0].mxu1 }
 0x1cc   : > { %v598_v18 = vadd.f32 %v1276_v16, %v597_v17  ;;  %v1338_v19 = vpop.f32.mrb[1].mxu1 }
 0x1cd   : > { %v600_v20 = vpop.f32.mrb[2].mxu1 }
 0x1ce   : > { %v603_v21 = vmax.f32 %v598_v18, 0.0  ;;  %v1339_v22 = vpop.f32.mrb[3].mxu1 }
 0x1d0   : > { %605 = vst.msk [vmem:[%s1741_s26] sm:$0xff] %vm604_vm4, %v603_v21  ;;  %1349 = vmatmul.mubr.msk.f32.vlgmr.msra.gmra.mrb[4].mxu1 %vm604_vm4, %v603_v21 }
 0x1d1   : > { %1353 = vmatprep.mubr.msk.bf16.mxu1 %vm1560_vm1, %v1559_v2 }
 0x2a3   : > { %v679_v26 = vpop.f32.mrb[4].mxu1 }
 0x2a4   : > { %v683_v27 = vpack.c.bf16 %v679_v26, %v679_v26  ;;  %v1350_v28 = vpop.f32.mrb[5].mxu1 }
 0x2a6   : > { %v692_v29 = vsel %vm474_vm0, %v683_v27, 0 }
 0x2a7   : > { %1352 = vmatpush3.bf16.msra.mxu1 %v692_v29 }
 0x2a8   : > { %1368 = vmatprep.subr.bf16.mxu1 %v1559_v2 }
 0x2aa   : > { %1354 = vmatmul.mubr.msk.bf16.vlgmr.msra.gmra.mrb[8].mxu1 %vm556_vm3, %v1720_v11 }
 0x2ab   : > { %1370 = vmatprep.mubr.msk.bf16.mxu1 %vm1560_vm1, %v1559_v2 }
 0x37d   : > { %v728_v36 = vpop.f32.mrb[8].mxu1 }
 0x37e   : > { %v729_v37 = vadd.f32 %v1279_v33, %v728_v36  ;;  %v1355_v38 = vpop.f32.mrb[9].mxu1 }
 0x37f   : > { %v731_v39 = vpop.f32.mrb[10].mxu1 }
 0x380   : > { %v734_v41 = vmax.f32 %v729_v37, 0.0  ;;  %v1356_v42 = vpop.f32.mrb[11].mxu1 }
 0x382   : > { %1281 = vst.msk [vmem:[%s1741_s26 + $0x8] sm:$0xff] %vm604_vm4, %v734_v41  ;;  %1366 = vmatmul.mubr.msk.f32.vlgmr.msra.gmra.mrb[2].mxu0 %vm604_vm4, %v734_v41 }
 0x383   : > { %1427 = vmatpush3.bf16.msra.mxu0 %v1426_v40  ;;  %1382 = vmatprep.mubr.msk.f32.mxu0 %vm1560_vm1, %v1559_v2 }
 0x384   : > { %1428 = vmatprep.subr.bf16.mxu0 %v1561_v4 }
 0x387   : > { %1430 = vmatpush3.bf16.msra.mxu0 %v1429_v45 }
 0x388   : > { %1431 = vmatprep.subr.bf16.mxu0 %v1561_v4 }
 0x38a   : > { %1383 = vmatmul.mubr.msk.f32.vlgmr.msra.gmra.mrb[4].mxu0 %vm604_vm4, %v734_v41 }
 0x38b   : > { %1433 = vmatpush3.bf16.msra.mxu0 %v1432_v48  ;;  %1393 = vmatprep.mubr.msk.f32.mxu0 %vm1560_vm1, %v1559_v2 }
 0x38c   : > { %1434 = vmatprep.subr.bf16.mxu0 %v1561_v4 }
 0x38f   : > { %1436 = vmatpush3.bf16.msra.mxu0 %v1435_v51 }
 0x390   : > { %1437 = vmatprep.subr.bf16.mxu0 %v1561_v4 }
 0x392   : > { %1394 = vmatmul.mubr.msk.f32.vlgmr.msra.gmra.mrb[4].mxu0 %vm604_vm4, %v603_v21 }
 0x393   : > { %1404 = vmatprep.mubr.msk.f32.mxu0 %vm1560_vm1, %v1559_v2  ;;  %1439 = vmatpush3.bf16.msra.mxu0 %v1438_v54 }
 0x394   : > { %1440 = vmatprep.subr.bf16.mxu0 %v1561_v4 }
 0x397   : > { %1442 = vmatpush3.bf16.msra.mxu0 %v1441_v61 }
 0x455   : > { %v810_v55 = vpop.f32.mrb[2].mxu0 }
 0x456   : > { %v814_v56 = vpack.c.bf16 %v810_v55, %v810_v55  ;;  %v1367_v57 = vpop.f32.mrb[3].mxu0 }
 0x458   : > { %v823_v58 = vsel %vm474_vm0, %v814_v56, 0 }
 0x459   : > { %1369 = vmatpush3.bf16.msra.mxu1 %v823_v58 }
 0x45a   : > { %1407 = vmatprep.subr.bf16.mxu1 %v1559_v2 }
 0x45c   : > { %1371 = vmatmul.mubr.msk.bf16.vlgmr.msra.gmra.mrb[12].mxu1 %vm556_vm3, %v1720_v11 }
 0x45d   : > { %1409 = vmatprep.mubr.msk.bf16.mxu1 %vm1560_vm1, %v1559_v2 }
 0x52f   : > { %v859_v63 = vpop.f32.mrb[12].mxu1 }
 0x530   : > { %v860_v0 = vadd.f32 %v1283_v62, %v859_v63  ;;  %v1372_v1 = vpop.f32.mrb[13].mxu1 }
 0x531   : > { %v862_v2 = vpop.f32.mrb[14].mxu1 }
 0x532   : > { %v865_v3 = vmax.f32 %v860_v0, 0.0  ;;  %v1373_v4 = vpop.f32.mrb[15].mxu1 }
 0x534   : > { %1285 = vst.msk [vmem:[%s1741_s26 + $0x10] sm:$0xff] %vm604_vm4, %v865_v3  ;;  %1405 = vmatmul.mubr.msk.f32.vlgmr.msra.gmra.mrb[4].mxu0 %vm604_vm4, %v865_v3  ;;  %s1562_s26 = smov [#allocation3]  }
 0x535   : > { %s1499_s11 = sshll.u32 %s1562_s26, 4  ;;  %s1500_s11 = int_to_ptr.vmem [resolvable:$false] %s1499_s11 }
 0x536   : > { %s1501_s18 = scalar_lea.vmem %s1500_s11, 768  ;;  %p1502_p0 = scmp.lt.s32.totalorder %s1840_s24, %s1500_s11 }
 0x537   : > { %p1503_p1 = scmp.lt.s32.totalorder %s1501_s18, %s1495_s2 }
 0x539   : > { %p1504_p2 = por %p1503_p1, %p1502_p0 }
 0x53b   : > { %p1505_p3 = pnand %p1504_p2, %p1498_p13 }
 0x607   : > { %v1089_v5 = vpop.f32.mrb[4].mxu0 }
 0x608   : > { %v1094_v6 = vpack.c.bf16 %v1089_v5, %v1089_v5  ;;  %v1406_v7 = vpop.f32.mrb[5].mxu0 }
 0x60a   : > { %v1103_v8 = vsel %vm474_vm0, %v1094_v6, 0 }
 0x60b   : > { %1408 = vmatpush3.bf16.msra.mxu1 %v1103_v8 }
 0x60e   : > { %1410 = vmatmul.mubr.msk.bf16.vlgmr.msra.gmra.mrb[16].mxu1 %vm556_vm3, %v1720_v11 }
 0x60f   : > { %1508 = shalt.err (!%p1505_p3)
}
 0x610   : > { %s1509_s17 = scalar_lea.hbm %s1845_s21, 384  ;;  %s1513_s22 = scalar_lea.hbm %s1907_s12, 768 }
 0x611   : > { %p1510_p4 = scmp.ne.s32.totalorder %s1845_s21, %s1509_s17  ;;  %p1514_p9 = scmp.lt.u32.totalorder %s1845_s21, %s1907_s12 }
 0x612   : > { %p1515_p10 = scmp.lt.u32.totalorder %s1513_s22, %s1509_s17  ;;  %p1517_p12 = scmp.lt.u32.totalorder %s1509_s17, %s1845_s21 }
 0x613   : > { %p1511_p7 = pnand %p1510_p4, %p1676_p5 }
 0x614   : > { %p1516_p11 = por %p1515_p10, %p1514_p9 }
 0x615   : > { %p1512_p8 = pneg %p1511_p7 }
 0x616   : > { %p1518_p13 = por %p1517_p12, %p1516_p11 }
 0x618   : > { %p1519_p0 = pnand %p1518_p13, %p1512_p8 }
 0x61a   : > { %1522 = shalt.err (!%p1519_p0)
}
 0x61b   : > { %s1563_s2 = smov 128   ;;  %s1564_s18 = smov 8   ;;  %v1289_v9 = vld [vmem:[#allocation2] ss:$0 sm:$0xff]  ;;  %vm1146_vm5 = vcmask 7168  }
 0x61c   : > { %1449 = dma.vmem_to_hbm [thread:$0]  (%p1676_p5), %s1840_s24, 384, %s1845_s21, %s1849_s25, %s1563_s2, %s1563_s2, %s1564_s18  }
 0x61d   : > { %s1917_s17 = sshll.u32 %s1695_s23, 3 }
 0x61e   : > { %s465_s22 = scalar_lea.vmem %s1908_s13, %s1917_s17 }
 0x6e1   : > { %v1139_v10 = vpop.f32.mrb[16].mxu1 }
 0x6e2   : > { %v1140_v11 = vadd.f32 %v1289_v9, %v1139_v10  ;;  %v1411_v12 = vpop.f32.mrb[17].mxu1 }
 0x6e3   : > { %v1142_v13 = vpop.f32.mrb[18].mxu1 }
 0x6e4   : > { %1493 = vtanh.f32 %v1140_v11  ;;  %v1412_v14 = vpop.f32.mrb[19].mxu1 }
 0x6ee   : > { %v1494_v15 = vpop.eup %1493 }
 0x6ef   : > { %1147 = vst.msk [vmem:[%s465_s22] sm:$0xff] %vm1146_vm5, %v1494_v15 }
 0x6f0 PF: > { %p1455_p5 = scmp.ge.s32.totalorder %s1557_s30, 2  ;;  %s1184_s19 = sand.u32 1, %s1545_s27  }
 0x6f1   : > { %s1185_s24 = scalar_lea.sflag [#allocation4], %s1184_s19 }
 0x6f2   : > { %p1452_p1 = pnand %p1455_p5, %p1680_p6 }
 0x6f4   : > { %1540 = dma.done.wait (!%p1452_p1), %s1185_s24, 384  }
 0x6f5   : > { %1542 = vsyncadd (!%p1452_p1), %s1185_s24, 4294966912  ;;  %s1918_s23 = sld [smem:[#allocation6_spill]]  ;;  %p26_p2 = scmp.ge.s32.totalorder %s1663_s15, 4  }
 0x6f6   : > { %s1919_s27 = smov %s1549_s28  ;;  %s1920_s28 = smov %s1553_s29 }
 0x6f7   : > { %s1922_s30 = smov %s1663_s15  ;;  %28 = sbr.rel (!%p26_p2) target bundleno = 6 (0x6), region = 120 }
 0x6fb   : > { %s1921_s29 = smov %s1918_s23 }
 0x6fe   :  { %1197 = vsyncpa [#allocation4], 1 }
 0x6ff   :  { %1199 = vsyncpa [#allocation4 + $0x1], 1 }

</bundles_post_ra>
